<compile_context>
chip_gen: v7x
topology: tpu7x:2x2x1
jax: 0.10.0
libtpu: 0.0.40
codegen_flags: <defaults>
</compile_context>

<pallas_src>
import functools
import math

import jax
import jax.numpy as jnp
from jax.experimental import pallas as pl
from jax.experimental.pallas import tpu as pltpu

LN_EPS = 1e-12  # HF ViT layer-norm eps


def _layer_norm(x, g, b):
    mu = jnp.mean(x, axis=-1, keepdims=True)
    var = jnp.mean((x - mu) ** 2, axis=-1, keepdims=True)
    return (x - mu) * jax.lax.rsqrt(var + LN_EPS) * g + b


# ---------- patch embedding (conv-as-matmul) + cls + pos, fused, no concat -----
def embed_kernel(p_ref, w_ref, bias_ref, cls_ref, pos_ref, o_ref, *, seq_len):
    # p_ref: (Np, K) bf16, w_ref: (K, D) bf16 -> f32 accumulate
    emb = jnp.dot(p_ref[...], w_ref[...],
                  preferred_element_type=jnp.float32) + bias_ref[...]
    # Direct slice writes instead of jnp.concatenate: removes an (S,D) VMEM temp
    # and a sublane-misaligned copy.
    o_ref[0:1, :] = (cls_ref[...] + pos_ref[0:1, :]).astype(o_ref.dtype)
    o_ref[1:seq_len, :] = (emb + pos_ref[1:seq_len, :]).astype(o_ref.dtype)
    s_pad, d = o_ref.shape
    if s_pad > seq_len:  # static branch: zero the sublane-padding rows
        o_ref[seq_len:, :] = jnp.zeros((s_pad - seq_len, d), o_ref.dtype)


def patch_embed(patches, w, bias, cls, pos, *, seq_len_padded):
    B, Np, K = patches.shape
    D = w.shape[1]
    S = Np + 1
    Sp = seq_len_padded
    return pl.pallas_call(
        functools.partial(embed_kernel, seq_len=S),
        out_shape=jax.ShapeDtypeStruct((B, Sp, D), jnp.float32),
        grid=(B,),
        in_specs=[
            pl.BlockSpec((None, Np, K), lambda i: (i, 0, 0)),
            pl.BlockSpec((K, D), lambda i: (0, 0)),
            pl.BlockSpec((1, D), lambda i: (0, 0)),
            pl.BlockSpec((1, D), lambda i: (0, 0)),
            pl.BlockSpec((S, D), lambda i: (0, 0)),
        ],
        out_specs=pl.BlockSpec((None, Sp, D), lambda i: (i, 0, 0)),
        compiler_params=pltpu.CompilerParams(dimension_semantics=("parallel",)),
    )(patches, w, bias, cls, pos)


# ----------- full encoder stack (all layers + final LN) in one kernel -----------
def encoder_stack_kernel(
    x_ref,
    ln1g_ref, ln1b_ref, wqkv_ref, bqkv_ref, wo_ref, bo_ref,
    ln2g_ref, ln2b_ref, w1_ref, b1_ref, w2_ref, b2_ref,
    lnfg_ref, lnfb_ref,
    o_ref, h_scr, *, num_heads, seq_len,
):
    layer = pl.program_id(1)
    n_layers = pl.num_programs(1)

    # Load this batch tile's tokens into the resident VMEM residual stream.
    @pl.when(layer == 0)
    def _():
        h_scr[...] = x_ref[...]

    x = h_scr[...]                       # (TB, Sp, D) f32 residual stream
    TB, Sp, D = x.shape
    dh = D // num_heads
    M = TB * Sp
    xf = x.reshape(M, D)                 # sublane-only merge (Sp % 8 == 0)

    # --- attention: LN -> fused QKV (one (M,D)@(D,3D) MXU matmul) -> SDPA -> proj
    h = _layer_norm(xf, ln1g_ref[...], ln1b_ref[...])
    qkv = jnp.dot(h.astype(jnp.bfloat16), wqkv_ref[...],
                  preferred_element_type=jnp.float32) + bqkv_ref[...]
    # 1/sqrt(dh) already folded into the Q columns of wqkv at init time.
    # dh == 128, so these head splits land exactly on 128-lane boundaries.
    q4 = qkv[:, :D].reshape(TB, Sp, num_heads, dh).astype(jnp.bfloat16)
    k4 = qkv[:, D:2 * D].reshape(TB, Sp, num_heads, dh).astype(jnp.bfloat16)
    v4 = qkv[:, 2 * D:].reshape(TB, Sp, num_heads, dh).astype(jnp.bfloat16)

    kmask = None
    if seq_len < Sp:                     # static branch: mask padded key rows
        kpos = jax.lax.broadcasted_iota(jnp.int32, (1, 1, Sp), 2)
        kmask = kpos < seq_len

    ctx_list = []
    # Static loop over the (small, compile-time) batch tile: single-batch-dim
    # einsums keep the proven Mosaic lowering while the layer's weight slab is
    # reused for all TB images (the weight-reuse win comes from the grid/blocking).
    for b in range(TB):
        sc = jnp.einsum("qhd,khd->hqk", q4[b], k4[b],
                        preferred_element_type=jnp.float32)        # (H, Sp, Sp)
        if kmask is not None:
            sc = jnp.where(kmask, sc, -1e30)
        sc = sc - jnp.max(sc, axis=-1, keepdims=True)
        p = jnp.exp(sc)                                            # unnormalized
        inv = pl.reciprocal(jnp.sum(p, axis=-1, keepdims=True), approx=True)
        ctx_h = jnp.einsum("hqk,khd->hqd", p.astype(jnp.bfloat16), v4[b],
                           preferred_element_type=jnp.float32)     # (H, Sp, dh)
        ctx_h = ctx_h * inv       # normalize AFTER PV: (S,D) mults, not (H,S,S)
        ctx_list.append(jnp.swapaxes(ctx_h, 0, 1).reshape(Sp, D))  # (Sp, D)
    ctx = jnp.concatenate(ctx_list, axis=0) if TB > 1 else ctx_list[0]  # (M, D)

    attn = jnp.dot(ctx.astype(jnp.bfloat16), wo_ref[...],
                   preferred_element_type=jnp.float32) + bo_ref[...]
    xf = xf + attn

    # --- MLP: LN -> fc1 -> GELU -> fc2 -> residual
    h2 = _layer_norm(xf, ln2g_ref[...], ln2b_ref[...])
    m = jnp.dot(h2.astype(jnp.bfloat16), w1_ref[...],
                preferred_element_type=jnp.float32) + b1_ref[...]
    # TODO(synk): HF ViT uses exact (erf) GELU; tanh approximation used here.
    m = jax.nn.gelu(m, approximate=True)
    m = jnp.dot(m.astype(jnp.bfloat16), w2_ref[...],
                preferred_element_type=jnp.float32) + b2_ref[...]
    xf = xf + m

    h_scr[...] = xf.reshape(TB, Sp, D)

    # Fused final LayerNorm + writeback on the last layer step.
    @pl.when(layer == n_layers - 1)
    def _():
        o_ref[...] = _layer_norm(xf, lnfg_ref[...], lnfb_ref[...]
                                 ).reshape(TB, Sp, D).astype(o_ref.dtype)


def encoder_stack(x, params, *, num_heads, seq_len, block_b=None):
    B, Sp, D = x.shape
    L = params["wqkv"].shape[0]
    if block_b is None:
        # TODO(synk): per-generation tuning — TB~2 on v7x (64 MiB VMEM),
        # 4-8 on v6e (128 MiB), >=2 on v5e; must divide B.
        block_b = math.gcd(B, 8)
    assert B % block_b == 0, (B, block_b)

    def wspec(arr):
        # Stacked per-layer parameter: one layer slab per step, indexed by l only.
        nd = arr.ndim
        return pl.BlockSpec((None,) + arr.shape[1:],
                            lambda b, l, nd=nd: (l,) + (0,) * (nd - 1))

    def cspec(arr):
        # Grid-invariant parameter (final LayerNorm).
        nd = arr.ndim
        return pl.BlockSpec(arr.shape, lambda b, l, nd=nd: (0,) * nd)

    stacked_names = ["ln1_g", "ln1_b", "wqkv", "bqkv", "wo", "bo",
                     "ln2_g", "ln2_b", "w1", "b1", "w2", "b2"]
    args = [params[n] for n in stacked_names]
    args += [params["final_ln_g"], params["final_ln_b"]]

    in_specs = [pl.BlockSpec((block_b, Sp, D), lambda b, l: (b, 0, 0))]
    in_specs += [wspec(params[n]) for n in stacked_names]
    in_specs += [cspec(params["final_ln_g"]), cspec(params["final_ln_b"])]

    return pl.pallas_call(
        functools.partial(encoder_stack_kernel, num_heads=num_heads,
                          seq_len=seq_len),
        out_shape=jax.ShapeDtypeStruct((B, Sp, D), jnp.float32),
        grid=(B // block_b, L),
        in_specs=in_specs,
        out_specs=pl.BlockSpec((block_b, Sp, D), lambda b, l: (b, 0, 0)),
        scratch_shapes=[pltpu.VMEM((block_b, Sp, D), jnp.float32)],
        compiler_params=pltpu.CompilerParams(
            dimension_semantics=("parallel", "arbitrary"),
            vmem_limit_bytes=48 * 1024 * 1024),
    )(x, *args)


# --------------------------------- parameters ---------------------------------
def init_vit_params(key, *, C, P, D, Dm, L, S, num_heads):
    dh = D // num_heads
    qscale = 1.0 / math.sqrt(dh)

    def nrm(k, shape, scale=0.02):
        return scale * jax.random.normal(k, shape)

    keys = iter(jax.random.split(key, 4 + 4 * L))
    params = {
        # flattened Conv2d(C, D, kernel=P, stride=P) weight, rows in (C,P,P) order
        "patch_w": nrm(next(keys), (C * P * P, D)).astype(jnp.bfloat16),
        "patch_b": jnp.zeros((1, D), jnp.float32),
        "cls": nrm(next(keys), (1, D)).astype(jnp.float32),
        "pos": nrm(next(keys), (S, D)).astype(jnp.float32),
        "final_ln_g": jnp.ones((1, D), jnp.float32),
        "final_ln_b": jnp.zeros((1, D), jnp.float32),
    }
    wqkv, wo, w1, w2 = [], [], [], []
    for _ in range(L):
        w = nrm(next(keys), (D, 3 * D))              # fused q|k|v
        w = w.at[:, :D].multiply(qscale)             # fold 1/sqrt(dh) into Q cols
        wqkv.append(w.astype(jnp.bfloat16))
        wo.append(nrm(next(keys), (D, D)).astype(jnp.bfloat16))
        w1.append(nrm(next(keys), (D, Dm)).astype(jnp.bfloat16))
        w2.append(nrm(next(keys), (Dm, D)).astype(jnp.bfloat16))
    params.update({
        "ln1_g": jnp.ones((L, 1, D), jnp.float32),
        "ln1_b": jnp.zeros((L, 1, D), jnp.float32),
        "wqkv": jnp.stack(wqkv),
        # q bias would also carry the 1/sqrt(dh) factor; it is zero here.
        "bqkv": jnp.zeros((L, 1, 3 * D), jnp.float32),
        "wo": jnp.stack(wo),
        "bo": jnp.zeros((L, 1, D), jnp.float32),
        "ln2_g": jnp.ones((L, 1, D), jnp.float32),
        "ln2_b": jnp.zeros((L, 1, D), jnp.float32),
        "w1": jnp.stack(w1),
        "b1": jnp.zeros((L, 1, Dm), jnp.float32),
        "w2": jnp.stack(w2),
        "b2": jnp.zeros((L, 1, D), jnp.float32),
    })
    return params


# ------------------------------- full forward ----------------------------------
def vit_encoder_forward(images, params, *, patch, num_heads, block_b=None):
    B, C, H, W = images.shape
    P = patch
    nh, nw = H // P, W // P
    Np = nh * nw
    K = C * P * P
    S = Np + 1
    Sp = ((S + 7) // 8) * 8              # pad sequence to a sublane multiple

    # patch extraction (JAX glue): NCHW -> [B, Np, C*P*P], pre-cast to bf16
    x = images.reshape(B, C, nh, P, nw, P)
    x = x.transpose(0, 2, 4, 1, 3, 5).reshape(B, Np, K).astype(jnp.bfloat16)

    h = patch_embed(x, params["patch_w"], params["patch_b"],
                    params["cls"], params["pos"], seq_len_padded=Sp)
    # embedding dropout in HF ViT is identity in eval mode

    h = encoder_stack(h, params, num_heads=num_heads, seq_len=S, block_b=block_b)

    # Slice off sublane-padding rows (padded keys were masked in softmax).
    # ViTEncoder.forward: dropout(last_hidden_state); eval-mode dropout = identity.
    # TODO(synk): training-mode dropout (p=0.5) would need pltpu.prng_* in a kernel.
    return h[:, :S, :]


if __name__ == "__main__":
    # small ViT config consistent with the module's forward:
    B, C, H, W = 2, 3, 16, 16            # images: NCHW
    P, D, Dm, L, NH = 8, 256, 512, 2, 2  # dh = 128 -> lane-aligned head slices
    S = (H // P) * (W // P) + 1          # cls token + patches

    images = jax.random.normal(jax.random.PRNGKey(0), (B, C, H, W), dtype=jnp.float32)
    params = init_vit_params(jax.random.PRNGKey(1), C=C, P=P, D=D, Dm=Dm, L=L,
                             S=S, num_heads=NH)

    out = vit_encoder_forward(images, params, patch=P, num_heads=NH, block_b=2)
    out = jax.block_until_ready(out)
    assert out.shape == (B, S, D), out.shape
    assert bool(jnp.all(jnp.isfinite(out)))
    print("KERNEL_OK")
</pallas_src>

<mosaic_0001>
module attributes {stable_mosaic.version = 11 : i64} {
  func.func @embed_kernel(%arg0: i32, %arg1: memref<1x4x192xbf16, #tpu.memory_space<vmem>>, %arg2: memref<192x256xbf16, #tpu.memory_space<vmem>>, %arg3: memref<1x256xf32, #tpu.memory_space<vmem>>, %arg4: memref<1x256xf32, #tpu.memory_space<vmem>>, %arg5: memref<5x256xf32, #tpu.memory_space<vmem>>, %arg6: memref<1x8x256xf32, #tpu.memory_space<vmem>>) attributes {dimension_semantics = [#tpu.dimension_semantics<parallel>], iteration_bounds = array<i64: 2>, scalar_prefetch = 0 : i64, scratch_operands = 0 : i64, tpu.core_type = #tpu.core_type<tc>, window_params = [{transform_indices = @transform_0, window_bounds = array<i64: 1, 4, 192>}, {pipeline_mode = #tpu.pipeline_mode<synchronous>, transform_indices = @transform_1, window_bounds = array<i64: 192, 256>}, {pipeline_mode = #tpu.pipeline_mode<synchronous>, transform_indices = @transform_2, window_bounds = array<i64: 1, 256>}, {pipeline_mode = #tpu.pipeline_mode<synchronous>, transform_indices = @transform_3, window_bounds = array<i64: 1, 256>}, {pipeline_mode = #tpu.pipeline_mode<synchronous>, transform_indices = @transform_4, window_bounds = array<i64: 5, 256>}, {transform_indices = @transform_5, window_bounds = array<i64: 1, 8, 256>}]} {
    %c0 = arith.constant 0 : index
    %c0_0 = arith.constant 0 : index
    %c0_1 = arith.constant 0 : index
    %0 = vector.load %arg1[%c0, %c0_0, %c0_1] : memref<1x4x192xbf16, #tpu.memory_space<vmem>>, vector<1x4x192xbf16>
    %1 = vector.shape_cast %0 : vector<1x4x192xbf16> to vector<4x192xbf16>
    %c0_2 = arith.constant 0 : index
    %c0_3 = arith.constant 0 : index
    %2 = vector.load %arg2[%c0_2, %c0_3] : memref<192x256xbf16, #tpu.memory_space<vmem>>, vector<192x256xbf16>
    %cst = arith.constant dense<0.000000e+00> : vector<4x256xf32>
    %3 = tpu.matmul %1, %2, %cst {dimension_numbers = #tpu.dot_dimension_numbers<[1], [0], [0], [1], [0, 0, 1, 1], [], []>} : vector<4x192xbf16>, vector<192x256xbf16>, vector<4x256xf32> -> vector<4x256xf32>
    %c0_4 = arith.constant 0 : index
    %c0_5 = arith.constant 0 : index
    %4 = vector.load %arg3[%c0_4, %c0_5] : memref<1x256xf32, #tpu.memory_space<vmem>>, vector<1x256xf32>
    %5 = vector.broadcast %4 : vector<1x256xf32> to vector<4x256xf32>
    %6 = arith.addf %3, %5 : vector<4x256xf32>
    %c0_6 = arith.constant 0 : index
    %c0_7 = arith.constant 0 : index
    %7 = vector.load %arg4[%c0_6, %c0_7] : memref<1x256xf32, #tpu.memory_space<vmem>>, vector<1x256xf32>
    %c0_8 = arith.constant 0 : index
    %c0_9 = arith.constant 0 : index
    %8 = vector.load %arg5[%c0_8, %c0_9] : memref<5x256xf32, #tpu.memory_space<vmem>>, vector<1x256xf32>
    %9 = arith.addf %7, %8 : vector<1x256xf32>
    %c0_10 = arith.constant 0 : index
    %c0_11 = arith.constant 0 : index
    %c0_12 = arith.constant 0 : index
    %10 = vector.load %arg6[%c0_10, %c0_11, %c0_12] : memref<1x8x256xf32, #tpu.memory_space<vmem>>, vector<1x1x256xf32>
    %11 = vector.shape_cast %10 : vector<1x1x256xf32> to vector<1x256xf32>
    %12 = vector.shape_cast %9 : vector<1x256xf32> to vector<1x1x256xf32>
    tpu.vector_store %arg6[%c0_10, %c0_11, %c0_12], %12 {strides = array<i32>} : memref<1x8x256xf32, #tpu.memory_space<vmem>>, vector<1x1x256xf32>,
    %c1 = arith.constant 1 : index
    %c0_13 = arith.constant 0 : index
    %13 = vector.load %arg5[%c1, %c0_13] : memref<5x256xf32, #tpu.memory_space<vmem>>, vector<4x256xf32>
    %14 = arith.addf %6, %13 : vector<4x256xf32>
    %c0_14 = arith.constant 0 : index
    %c1_15 = arith.constant 1 : index
    %c0_16 = arith.constant 0 : index
    %15 = vector.load %arg6[%c0_14, %c1_15, %c0_16] : memref<1x8x256xf32, #tpu.memory_space<vmem>>, vector<1x4x256xf32>
    %16 = vector.shape_cast %15 : vector<1x4x256xf32> to vector<4x256xf32>
    %17 = vector.shape_cast %14 : vector<4x256xf32> to vector<1x4x256xf32>
    tpu.vector_store %arg6[%c0_14, %c1_15, %c0_16], %17 {strides = array<i32>} : memref<1x8x256xf32, #tpu.memory_space<vmem>>, vector<1x4x256xf32>,
    %cst_17 = arith.constant 0.000000e+00 : f32
    %18 = vector.broadcast %cst_17 : f32 to vector<3x256xf32>
    %c0_18 = arith.constant 0 : index
    %c5 = arith.constant 5 : index
    %c0_19 = arith.constant 0 : index
    %19 = vector.load %arg6[%c0_18, %c5, %c0_19] : memref<1x8x256xf32, #tpu.memory_space<vmem>>, vector<1x3x256xf32>
    %20 = vector.shape_cast %19 : vector<1x3x256xf32> to vector<3x256xf32>
    %21 = vector.shape_cast %18 : vector<3x256xf32> to vector<1x3x256xf32>
    tpu.vector_store %arg6[%c0_18, %c5, %c0_19], %21 {strides = array<i32>} : memref<1x8x256xf32, #tpu.memory_space<vmem>>, vector<1x3x256xf32>,
    return
  }
  func.func @transform_0(%arg0: i32) -> (i32, i32, i32) {
    %c0_i32 = arith.constant 0 : i32
    %c0_i32_0 = arith.constant 0 : i32
    %c0_i32_1 = arith.constant 0 : i32
    return %arg0, %c0_i32, %c0_i32_0 : i32, i32, i32
  }
  func.func @transform_1(%arg0: i32) -> (i32, i32) {
    %c0_i32 = arith.constant 0 : i32
    %c0_i32_0 = arith.constant 0 : i32
    %c0_i32_1 = arith.constant 0 : i32
    return %c0_i32, %c0_i32_0 : i32, i32
  }
  func.func @transform_2(%arg0: i32) -> (i32, i32) {
    %c0_i32 = arith.constant 0 : i32
    %c0_i32_0 = arith.constant 0 : i32
    %c0_i32_1 = arith.constant 0 : i32
    return %c0_i32, %c0_i32_0 : i32, i32
  }
  func.func @transform_3(%arg0: i32) -> (i32, i32) {
    %c0_i32 = arith.constant 0 : i32
    %c0_i32_0 = arith.constant 0 : i32
    %c0_i32_1 = arith.constant 0 : i32
    return %c0_i32, %c0_i32_0 : i32, i32
  }
  func.func @transform_4(%arg0: i32) -> (i32, i32) {
    %c0_i32 = arith.constant 0 : i32
    %c0_i32_0 = arith.constant 0 : i32
    %c0_i32_1 = arith.constant 0 : i32
    return %c0_i32, %c0_i32_0 : i32, i32
  }
  func.func @transform_5(%arg0: i32) -> (i32, i32, i32) {
    %c0_i32 = arith.constant 0 : i32
    %c0_i32_0 = arith.constant 0 : i32
    %c0_i32_1 = arith.constant 0 : i32
    return %arg0, %c0_i32, %c0_i32_0 : i32, i32, i32
  }
}

</mosaic_0001>

<bundles_post_ra>
// kernel: tpu_custom_call.1
= control target key start
LH: loop header
LB: loop body
LE: loop exit
PB: predicated region body
PF: predicated region fallthrough
CT: control target
= control target key end

     0   :  { %10 = vsyncpa [#allocation3], 0  ;;  %s1197_s0 = inlined_call_operand.hbm [shape: bf16[2,4,192], index: 0, kind: input, shape index: {}]   ;;  %s1198_s1 = inlined_call_operand.hbm [shape: bf16[192,256], index: 1, kind: input, shape index: {}]   ;;  %s1199_s2 = inlined_call_operand.vmem [shape: f32[1,256], index: 2, kind: input, shape index: {}]   ;;  %s1200_s3 = inlined_call_operand.vmem [shape: f32[1,256], index: 3, kind: input, shape index: {}]   ;;  %s1201_s4 = inlined_call_operand.hbm [shape: f32[5,256], index: 4, kind: input, shape index: {}]   ;;  %s1202_s5 = inlined_call_operand.hbm [shape: f32[2,8,256], index: 5, kind: output, shape index: {}]  }
   0x1   :  { %12 = vsyncpa [#allocation3 + $0x1], 0 }
   0x2   :  { %13 = vsyncpa [#allocation6], 0 }
   0x3   :  { %14 = vsyncpa [#allocation4], 0 }
   0x4   :  { %16 = vsyncpa [#allocation4 + $0x1], 0  ;;  %s961_s18 = smov 0   ;;  %s963_s19 = smov 0  }
   0x5   :  { %s965_s20 = smov 0   ;;  %s967_s21 = smov 0  }
   0x6 LB: > { %s982_s22 = sadd.s32 4294967295, %s922_s21   ;;  %s614_s23 = sadd.s32 4294967294, %s922_s21   ;;  %s922_s21 = sphi %s967_s21, %s1222_s21   ;;  %s918_s20 = sphi %s965_s20, %s1221_s20   ;;  %s914_s19 = sphi %s963_s19, %s1220_s19   ;;  %s910_s18 = sphi %s961_s18, %s1219_s18  }
   0x7   : > { %p42_p0 = scmp.ne.s32.totalorder %s914_s19, %s910_s18  ;;  %p1203_p1 = scmp.eq.s32.totalorder %s982_s22, 0 }
   0x8   : > { %p156_p3 = scmp.eq.s32.totalorder %s614_s23, 1  ;;  %p615_p5 = scmp.ge.s32.totalorder %s922_s21, 1 }
   0x9   : > { %p991_p4 = por %p1203_p1, %p42_p0  ;;  %p163_p7 = scmp.lt.s32.totalorder %s922_s21, 3 }
   0xa   : > { %p996_p6 = por %p156_p3, %p42_p0  ;;  %s924_s27 = smov [#allocation5]  }
   0xb   : > { %s1206_s24 = scalar_select %p991_p4, 1, 0 }
   0xc   : > { %s1207_s25 = scalar_select %p996_p6, 1, 0 }
   0xd   : > { %p1001_p8 = pnand %p615_p5, %p163_p7  ;;  %s175_s28 = sshll.u32 %s924_s27, 4  ;;  %s1005_s28 = int_to_ptr.vmem [resolvable:$true] %s175_s28 }
   0xe   : > { %s925_s30 = smov [#allocation7]   ;;  %s766_s9 = scalar_lea.hbm %s1198_s1, 3072 }
   0xf   : > { %p672_p9 = pneg %p1001_p8  ;;  %s195_s6 = sshll.u32 %s925_s30, 4  ;;  %s1016_s6 = int_to_ptr.vmem [resolvable:$true] %s195_s6 }
  0x10   : > { %p767_p12 = scmp.ne.s32.totalorder %s1198_s1, %s766_s9  ;;  %p773_p5 = scmp.lt.u32.totalorder %s766_s9, %s1198_s1 }
  0x11   : > { %p1012_p11 = pnand %p672_p9, %p1203_p1 }
  0x13   : > { %p768_p13 = pneg %p1012_p11 }
  0x15   : > { %p769_p0 = pnand %p768_p13, %p767_p12 }
  0x17   : > { %p770_p3 = pneg %p769_p0 }
  0x19   : > { %p775_p7 = pnand %p773_p5, %p770_p3 }
  0x1b   : > { %778 = shalt.err (!%p775_p7)
}
  0x1c   : > { %s779_s14 = scalar_lea.vmem %s1005_s28, 3072  ;;  %p787_p2 = scmp.lt.s32.totalorder %s1005_s28, %s1005_s28 }
  0x1d   : > { %p780_p9 = scmp.ne.s32.totalorder %s1005_s28, %s779_s14  ;;  %p788_p12 = scmp.lt.s32.totalorder %s779_s14, %s779_s14 }
  0x1f   : > { %p782_p10 = pnand %p780_p9, %p768_p13  ;;  %p789_p0 = por %p788_p12, %p787_p2 }
  0x21   : > { %p783_p1 = pneg %p782_p10 }
  0x23   : > { %p790_p6 = pnand %p789_p0, %p783_p1 }
  0x25   : > { %793 = shalt.err (!%p790_p6)
}
  0x26   : > { %s926_s15 = smov 128   ;;  %s927_s16 = smov 8  }
  0x27   : > { %675 = dma.hbm_to_vmem [thread:$0]  (!%p1012_p11), %s1198_s1, 3072, %s1005_s28, [#allocation6], %s926_s15, %s926_s15, %s927_s16  }
  0x28   : > { %s794_s7 = scalar_lea.hbm %s1201_s4, 256 }
  0x29   : > { %p795_p2 = scmp.ne.s32.totalorder %s1201_s4, %s794_s7  ;;  %p801_p10 = scmp.lt.u32.totalorder %s794_s7, %s1201_s4 }
  0x2b   : > { %p797_p1 = pnand %p795_p2, %p768_p13 }
  0x2d   : > { %p798_p6 = pneg %p797_p1 }
  0x2f   : > { %p803_p3 = pnand %p801_p10, %p798_p6 }
  0x31   : > { %806 = shalt.err (!%p803_p3)
}
  0x32   : > { %s807_s28 = scalar_lea.vmem %s1016_s6, 256  ;;  %p815_p12 = scmp.lt.s32.totalorder %s1016_s6, %s1016_s6 }
  0x33   : > { %p808_p5 = scmp.ne.s32.totalorder %s1016_s6, %s807_s28  ;;  %p816_p0 = scmp.lt.s32.totalorder %s807_s28, %s807_s28 }
  0x35   : > { %p810_p7 = pnand %p808_p5, %p768_p13  ;;  %p817_p2 = por %p816_p0, %p815_p12 }
  0x37   : > { %p811_p9 = pneg %p810_p7 }
  0x39   : > { %p818_p1 = pnand %p817_p2, %p811_p9 }
  0x3b   : > { %821 = shalt.err (!%p818_p1)
}
  0x3c   : > { %678 = dma.hbm_to_vmem [thread:$0]  (!%p1012_p11), %s1201_s4, 256, %s1016_s6, [#allocation6]  }
  0x3d   : > { %s1071_s14 = sadd.s32 1, %s922_s21   ;;  %s29_s29 = sadd.s32 1, %s918_s20 }
  0x3e   : > { %s26_s15 = ssub.s32 %s922_s21, %s1071_s14  ;;  %p36_p13 = scmp.ne.s32.totalorder %s918_s20, %s914_s19 }
  0x3f   : > { %p27_p6 = scmp.eq.s32.totalorder %s26_s15, 0  ;;  %p37_p10 = scmp.eq.s32.totalorder %s922_s21, 0 }
  0x40   : > { %p1210_p3 = scmp.eq.s32.totalorder %s982_s22, 1  ;;  %p689_p7 = scmp.lt.s32.totalorder %s922_s21, 2 }
  0x41   : > { %s1087_s17 = scalar_select %p27_p6, %s918_s20, %s29_s29  }
  0x42   : > { %p1081_p5 = por %p1210_p3, %p36_p13  ;;  %p38_p9 = por %p37_p10, %p36_p13 }
  0x43   : > { %s206_s23 = sand.u32 1, %s918_s20   ;;  %s658_s6 = sshll.u32 %s922_s21, 6 }
  0x44   : > { %s1211_s16 = scalar_select %p1081_p5, 1, 0 }
  0x45   : > { %s619_s27 = sshll.u32 %s206_s23, 2  ;;  %s1094_s8 = scalar_lea.hbm %s1197_s0, %s658_s6 }
  0x46   : > { %s210_s9 = scalar_lea.vmem [#allocation2], %s619_s27  ;;  %p1098_p11 = pnand %p689_p7, %p38_p9 }
  0x47   : > { %s218_s10 = sshll.u32 %s210_s9, 4  ;;  %s207_s28 = scalar_lea.sflag [#allocation3], %s206_s23  ;;  %s1096_s10 = int_to_ptr.vmem [resolvable:$true] %s218_s10 }
  0x48   : > { %s822_s12 = scalar_lea.hbm %s1094_s8, 64  ;;  %p824_p0 = pneg %p1098_p11 }
  0x49   : > { %p823_p12 = scmp.ne.s32.totalorder %s1094_s8, %s822_s12  ;;  %s827_s15 = scalar_lea.hbm %s1197_s0, 128 }
  0x4a   : > { %p828_p13 = scmp.lt.u32.totalorder %s1094_s8, %s1197_s0  ;;  %p829_p6 = scmp.lt.u32.totalorder %s827_s15, %s822_s12 }
  0x4b   : > { %p825_p2 = pnand %p824_p0, %p823_p12  ;;  %p831_p3 = scmp.lt.u32.totalorder %s822_s12, %s1094_s8 }
  0x4c   : > { %p830_p10 = por %p829_p6, %p828_p13 }
  0x4d   : > { %p826_p1 = pneg %p825_p2 }
  0x4e   : > { %p832_p7 = por %p831_p3, %p830_p10 }
  0x50   : > { %p833_p9 = pnand %p832_p7, %p826_p1 }
  0x52   : > { %836 = shalt.err (!%p833_p9)
}
  0x53   : > { %s837_s23 = scalar_lea.vmem %s1096_s10, 64  ;;  %s928_s30 = smov [#allocation2]  }
  0x54   : > { %p838_p12 = scmp.ne.s32.totalorder %s1096_s10, %s837_s23  ;;  %s842_s7 = sshll.u32 %s928_s30, 4  ;;  %s843_s7 = int_to_ptr.vmem [resolvable:$false] %s842_s7 }
  0x55   : > { %s844_s9 = scalar_lea.vmem %s843_s7, 128  ;;  %p845_p4 = scmp.lt.s32.totalorder %s1096_s10, %s843_s7 }
  0x56   : > { %p840_p2 = pnand %p838_p12, %p824_p0  ;;  %p846_p13 = scmp.lt.s32.totalorder %s844_s9, %s837_s23 }
  0x58   : > { %p841_p5 = pneg %p840_p2  ;;  %p847_p6 = por %p846_p13, %p845_p4 }
  0x5a   : > { %p848_p10 = pnand %p847_p6, %p841_p5 }
  0x5c   : > { %851 = shalt.err (!%p848_p10)
}
  0x5d   : > { %682 = dma.hbm_to_vmem [thread:$0]  (!%p1098_p11), %s1094_s8, 64, %s1096_s10, %s207_s28  }
  0x5e   : > { %227 = sbr.rel (%p1001_p8) target bundleno = 387 (0x183), region = 40  ;;  %s1130_s12 = sand.u32 (!%p1001_p8), 1, %s914_s19  }
  0x5f   : > { %s623_s13 = sshll.u32 (!%p1001_p8), %s1130_s12, 2  ;;  %s230_s29 = scalar_lea.sflag (!%p1001_p8), [#allocation3], %s1130_s12 }
  0x60   : > { %s233_s15 = scalar_lea.vmem (!%p1001_p8), [#allocation2], %s623_s13  ;;  %p1213_p4 = scmp.ne.s32.totalorder (!%p1001_p8), %s1206_s24, 0 }
  0x65   : > { %897 = dma.done.wait (%p1213_p4), %s230_s29, 64  }
  0x66   : > { %899 = vsyncadd (%p1213_p4), %s230_s29, 4294967232  ;;  %p1214_p5 = scmp.eq.s32.totalorder %s982_s22, 0 }
  0x68   : > { %901 = dma.done.wait (%p1214_p5), [#allocation6], 3328   ;;  %p1215_p11 = pmov %p1214_p5 }
  0x69   : > { %v730_v0 = vld [vmem:[#allocation5 + $0x4] ss:$8 sps:$4 sm:$0xff]   ;;  %v732_v1 = vld [vmem:[#allocation5] ss:$8 sps:$4 sm:$0xff]   ;;  %v733_v2 = vld [vmem:[#allocation5 + $0x14] ss:$8 sps:$4 sm:$0xff]   ;;  %v296_v26 = vlaneseq }
  0x6a   : > { %903 = vsyncadd (%p1215_p11), [#allocation6], 4294963968  ;;  %440 = vmatprep.subr.bf16.mxu0 %v730_v0  ;;  %v735_v3 = vld [vmem:[#allocation5 + $0x10] ss:$8 sps:$4 sm:$0xff]   ;;  %v736_v4 = vld [vmem:[#allocation5 + $0x24] ss:$8 sps:$4 sm:$0xff]  }
  0x6b   : > { %441 = vmatpush1.bf16.msra.mxu0 %v732_v1  ;;  %v738_v5 = vld [vmem:[#allocation5 + $0x20] ss:$8 sps:$4 sm:$0xff]   ;;  %v739_v6 = vld [vmem:[#allocation5 + $0x34] ss:$8 sps:$4 sm:$0xff]   ;;  %v741_v7 = vld [vmem:[#allocation5 + $0x30] ss:$8 sps:$4 sm:$0xff]  }
  0x6c   : > { %442 = vmatprep.subr.bf16.mxu0 %v733_v2  ;;  %v742_v8 = vld [vmem:[#allocation5 + $0x44] ss:$8 sps:$4 sm:$0xff]   ;;  %v744_v9 = vld [vmem:[#allocation5 + $0x40] ss:$8 sps:$4 sm:$0xff]   ;;  %vm436_vm0 = vcmask 523264   ;;  %s626_s24 = sshll.u32 %s1130_s12, 4 }
  0x6d   : > { %v745_v10 = vld [vmem:[#allocation5 + $0x54] ss:$8 sps:$4 sm:$0xff]   ;;  %v747_v13 = vld [vmem:[#allocation5 + $0x50] ss:$8 sps:$4 sm:$0xff]   ;;  %v748_v14 = vld [vmem:[#allocation5 + $0x64] ss:$8 sps:$4 sm:$0xff]  }
  0x6e   : > { %v627_v11 = vld.sshfl [vmem:[%s233_s15] sm:$0x33 pattern:$0x76325410]  ;;  %v750_v15 = vld [vmem:[#allocation5 + $0x60] ss:$8 sps:$4 sm:$0xff]  }
  0x6f   : > { %443 = vmatpush1.bf16.msra.mxu0 %v735_v3  ;;  %v314_v12 = vcombine.high %v627_v11, %v627_v11  ;;  %v751_v16 = vld [vmem:[#allocation5 + $0x74] ss:$8 sps:$4 sm:$0xff]   ;;  %v753_v17 = vld [vmem:[#allocation5 + $0x70] ss:$8 sps:$4 sm:$0xff]   ;;  %v754_v18 = vld [vmem:[#allocation5 + $0x84] ss:$8 sps:$4 sm:$0xff]  }
  0x70   : > { %444 = vmatprep.subr.bf16.mxu0 %v736_v4  ;;  %v756_v19 = vld [vmem:[#allocation5 + $0x80] ss:$8 sps:$4 sm:$0xff]   ;;  %v757_v20 = vld [vmem:[#allocation5 + $0x94] ss:$8 sps:$4 sm:$0xff]   ;;  %v759_v21 = vld [vmem:[#allocation5 + $0x90] ss:$8 sps:$4 sm:$0xff]  }
  0x71   : > { %652 = vmatprep.mubr.msk.bf16.mxu0 %vm436_vm0, %v314_v12  ;;  %v760_v22 = vld [vmem:[#allocation5 + $0xa4] ss:$8 sps:$4 sm:$0xff]   ;;  %v762_v23 = vld [vmem:[#allocation5 + $0xa0] ss:$8 sps:$4 sm:$0xff]   ;;  %v763_v24 = vld [vmem:[#allocation5 + $0xb4] ss:$8 sps:$4 sm:$0xff]  }
  0x72   : > { %v765_v25 = vld [vmem:[#allocation5 + $0xb0] ss:$8 sps:$4 sm:$0xff]   ;;  %v482_v28 = vld [vmem:[#allocation7] ss:$8 sm:$0x3]  ;;  %vm486_vm1 = vcmp.lt.s32.totalorder %v296_v26, 256 }
  0x73   : > { %445 = vmatpush1.bf16.msra.mxu0 %v738_v5  ;;  %v481_v27 = vld [vmem:[%s1200_s3] sm:$0x3]  ;;  %s267_s10 = scalar_lea.vmem [#allocation8], %s626_s24  ;;  %v929_v30 = vmov 0.0   ;;  %v297_v31 = vshrl.u32 %v296_v26, 7  ;;  %s659_s27 = sshll.u32 %s982_s22, 8 }
  0x74   : > { %446 = vmatprep.subr.bf16.mxu0 %v739_v6  ;;  %v483_v29 = vadd.f32 %v482_v28, %v481_v27  ;;  %508 = vst [vmem:[%s267_s10] sm:$0xe0] %v929_v30  ;;  %509 = vst [vmem:[%s267_s10 + $0x8] sm:$0xe0] %v929_v30  ;;  %v294_v33 = vld [vmem:[%s1199_s2] sm:$0x3]  ;;  %s525_s6 = sshll.u32 %s267_s10, 4  ;;  %s1153_s7 = scalar_lea.hbm %s1202_s5, %s659_s27  ;;  %s1155_s6 = int_to_ptr.vmem [resolvable:$true] %s525_s6 }
  0x75   : > { %v298_v32 = vsub.s32 0, %v297_v31  ;;  %v302_v34 = vsub.s32 1, %v297_v31  ;;  %v490_v35 = vld [vmem:[#allocation7] sm:$0x1e]  ;;  %v491_v37 = vld [vmem:[#allocation7 + $0x8] sm:$0x1e] }
  0x76   : > { %488 = vst.msk [vmem:[%s267_s10] ss:$8 sm:$0x3] %vm486_vm1, %v483_v29  ;;  %v494_v39 = vrot.slane %v490_v35, 1  ;;  %v495_v41 = vrot.slane %v491_v37, 1  ;;  %s511_s9 = scalar_lea.sflag [#allocation4], %s1130_s12 }
  0x77   : > { %447 = vmatpush1.bf16.msra.mxu0 %v741_v7  ;;  %v299_v36 = vrot.slane %v294_v33, %v298_v32  ;;  %v303_v38 = vrot.slane %v294_v33, %v302_v34  ;;  %s852_s13 = scalar_lea.vmem %s1155_s6, 256  ;;  %p1216_p0 = scmp.ne.s32.totalorder %s1211_s16, 0 }
  0x78   : > { %448 = vmatprep.subr.bf16.mxu0 %v742_v8  ;;  %p853_p8 = scmp.ne.s32.totalorder %s1155_s6, %s852_s13  ;;  %s930_s22 = smov [#allocation8]  }
  0x79   : > { %s856_s29 = sshll.u32 %s930_s22, 4  ;;  %s857_s29 = int_to_ptr.vmem [resolvable:$false] %s856_s29 }
  0x7a   : > { %p854_p1 = pnand %p853_p8, %p1216_p0  ;;  %s858_s15 = scalar_lea.vmem %s857_s29, 512 }
  0x7b   : > { %449 = vmatpush1.bf16.msra.mxu0 %v744_v9  ;;  %p859_p7 = scmp.lt.s32.totalorder %s1155_s6, %s857_s29  ;;  %p860_p9 = scmp.lt.s32.totalorder %s858_s15, %s852_s13 }
  0x7c   : > { %450 = vmatprep.subr.bf16.mxu0 %v745_v10  ;;  %p855_p3 = pneg %p854_p1 }
  0x7d   : > { %p861_p12 = por %p860_p9, %p859_p7 }
  0x7f   : > { %451 = vmatpush1.bf16.msra.mxu0 %v747_v13  ;;  %p862_p2 = pnand %p861_p12, %p855_p3 }
  0x80   : > { %452 = vmatprep.subr.bf16.mxu0 %v748_v14 }
  0x83   : > { %453 = vmatpush1.bf16.msra.mxu0 %v750_v15 }
  0x84   : > { %454 = vmatprep.subr.bf16.mxu0 %v751_v16 }
  0x87   : > { %455 = vmatpush1.bf16.msra.mxu0 %v753_v17 }
  0x88   : > { %456 = vmatprep.subr.bf16.mxu0 %v754_v18 }
  0x8b   : > { %457 = vmatpush1.bf16.msra.mxu0 %v756_v19 }
  0x8c   : > { %458 = vmatprep.subr.bf16.mxu0 %v757_v20 }
  0x8f   : > { %459 = vmatpush1.bf16.msra.mxu0 %v759_v21 }
  0x90   : > { %460 = vmatprep.subr.bf16.mxu0 %v760_v22 }
  0x93   : > { %461 = vmatpush1.bf16.msra.mxu0 %v762_v23 }
  0x94   : > { %462 = vmatprep.subr.bf16.mxu0 %v763_v24 }
  0x97   : > { %463 = vmatpush1.bf16.msra.mxu0 %v765_v25 }
  0x9a   : > { %473 = vmatmul.mubr.bf16.vlgmr.msra.gmra.mrb[0].mxu0 %v627_v11 }
 0x16d   : > { %v474_v40 = vpop.f32.mrb[0].mxu0 }
 0x16e   : > { %v475_v42 = vadd.f32 %v474_v40, %v299_v36  ;;  %v476_v43 = vpop.f32.mrb[1].mxu0 }
 0x16f   : > { %v477_v44 = vadd.f32 %v476_v43, %v303_v38  ;;  %v478_v45 = vpop.f32.mrb[2].mxu0 }
 0x170   : > { %v498_v46 = vadd.f32 %v494_v39, %v475_v42  ;;  %v479_v47 = vpop.f32.mrb[3].mxu0 }
 0x171   : > { %v499_v48 = vadd.f32 %v495_v41, %v477_v44 }
 0x172   : > { %v502_v49 = vrot.slane %v498_v46, 7 }
 0x173   : > { %v503_v50 = vrot.slane %v499_v48, 7 }
 0x174   : > { %506 = vst [vmem:[%s267_s10] sm:$0x1e] %v502_v49 }
 0x175   : > { %507 = vst [vmem:[%s267_s10 + $0x8] sm:$0x1e] %v503_v50 }
 0x176   : > { %865 = shalt.err (!%p862_p2)
}
 0x177   : > { %s866_s12 = scalar_lea.hbm %s1153_s7, 256  ;;  %s870_s8 = scalar_lea.hbm %s1202_s5, 512 }
 0x178   : > { %p867_p13 = scmp.ne.s32.totalorder %s1153_s7, %s866_s12  ;;  %p871_p4 = scmp.lt.u32.totalorder %s1153_s7, %s1202_s5 }
 0x179   : > { %p872_p5 = scmp.lt.u32.totalorder %s870_s8, %s866_s12  ;;  %p874_p8 = scmp.lt.u32.totalorder %s866_s12, %s1153_s7 }
 0x17a   : > { %p868_p6 = pnand %p867_p13, %p1216_p0 }
 0x17b   : > { %p873_p11 = por %p872_p5, %p871_p4 }
 0x17c   : > { %p869_p10 = pneg %p868_p6 }
 0x17d   : > { %p875_p1 = por %p874_p8, %p873_p11 }
 0x17f   : > { %p876_p3 = pnand %p875_p1, %p869_p10 }
 0x181   : > { %879 = shalt.err (!%p876_p3)
}
 0x182   : > { %670 = dma.vmem_to_hbm [thread:$0]  (%p1216_p0), %s1155_s6, 256, %s1153_s7, %s511_s9  }
 0x183 PF: > { %s537_s28 = sand.u32 1, %s910_s18   ;;  %p1217_p7 = scmp.ne.s32.totalorder %s1207_s25, 0 }
 0x184   : > { %p1218_p9 = scmp.ge.s32.totalorder %s922_s21, 2  ;;  %s538_s27 = scalar_lea.sflag [#allocation4], %s537_s28 }
 0x186   : > { %p684_p12 = pnand %p1218_p9, %p1217_p7 }
 0x188   : > { %905 = dma.done.wait (!%p684_p12), %s538_s27, 256  }
 0x189   : > { %907 = vsyncadd (!%p684_p12), %s538_s27, 4294967040  ;;  %p19_p2 = scmp.ge.s32.totalorder %s1071_s14, 4   ;;  %s1219_s18 = smov %s914_s19 }
 0x18a   : > { %s1220_s19 = smov %s918_s20  ;;  %s1221_s20 = smov %s1087_s17 }
 0x18b   : > { %s1222_s21 = smov %s1071_s14  ;;  %21 = sbr.rel (!%p19_p2) target bundleno = 6 (0x6), region = 93 }
 0x192   :  { %543 = vsyncpa [#allocation3], 1 }
 0x193   :  { %545 = vsyncpa [#allocation3 + $0x1], 1 }
 0x194   :  { %546 = vsyncpa [#allocation6], 1 }
 0x195   :  { %547 = vsyncpa [#allocation4], 1 }
 0x196   :  { %549 = vsyncpa [#allocation4 + $0x1], 1 }

</bundles_post_ra>
